<compile_context>
chip_gen: v7x
topology: tpu7x:2x2x1
jax: 0.10.0
libtpu: 0.0.40
codegen_flags: <defaults>
</compile_context>

<pallas_src>
import functools

import jax
import jax.numpy as jnp
from jax.experimental import pallas as pl
from jax.experimental.pallas import tpu as pltpu


def _round_up(x, m):
    return (x + m - 1) // m * m


# --------------------------------------------------------------------------
# Kernels
# --------------------------------------------------------------------------
def _lstm_stack_kernel(hid_pad, k_in,
                       emb_ref, h_in_ref, c_in_ref, w_ref, b_ref,
                       h_out_ref, c_out_ref, xh_ref):
    """One grid step == one LSTM layer (seq_len == 1).

    emb_ref:   (B_pad, K_in)                bf16   layer-0 input (resident)
    h_in_ref:  (1, B_pad, H_pad)            f32    this layer's h_{t-1}
    c_in_ref:  (1, B_pad, H_pad)            f32    this layer's c_{t-1}
    w_ref:     (1, K_in + H_pad, 4*H_pad)   bf16   fused [W_ih^T ; W_hh^T]
    b_ref:     (1, 1, 4*H_pad)              f32    fused bias (b_ih + b_hh)
    h_out_ref: (1, B_pad, H_pad)            f32
    c_out_ref: (1, B_pad, H_pad)            f32
    xh_ref:    (B_pad, K_in + H_pad)        bf16   scratch: (x || h_prev) operand
    """
    l = pl.program_id(0)
    Hp = hid_pad

    @pl.when(l == 0)
    def _():
        # layer-0 input = (padded, bf16) embedded tokens
        xh_ref[:, :k_in] = emb_ref[...]

    # right half of the fused operand = this layer's previous hidden state
    xh_ref[:, k_in:] = h_in_ref[0].astype(jnp.bfloat16)

    # fused gate matmul: (B, K_in+Hp) @ (K_in+Hp, 4*Hp), bf16 in / f32 accumulate
    gates = (
        jnp.dot(xh_ref[...], w_ref[0], preferred_element_type=jnp.float32)
        + b_ref[0]
    )                                           # (B_pad, 4*Hp) f32

    # gate order (i, f, g, o); Hp is a multiple of 128 so slices are lane-aligned
    i_g = jax.nn.sigmoid(gates[:, 0 * Hp:1 * Hp])
    f_g = jax.nn.sigmoid(gates[:, 1 * Hp:2 * Hp])
    g_g = jnp.tanh(gates[:, 2 * Hp:3 * Hp])
    o_g = jax.nn.sigmoid(gates[:, 3 * Hp:4 * Hp])

    c_new = f_g * c_in_ref[0] + i_g * g_g
    h_new = o_g * jnp.tanh(c_new)

    h_out_ref[0] = h_new
    c_out_ref[0] = c_new

    # TODO(synk): inter-layer dropout (training mode) not applied; eval semantics.
    # stage this layer's output as the next layer's x operand (bf16)
    xh_ref[:, :Hp] = h_new.astype(jnp.bfloat16)
    if k_in > Hp:  # static; only when emb_dim padded wider than hid_dim
        xh_ref[:, Hp:k_in] = jnp.zeros((xh_ref.shape[0], k_in - Hp), jnp.bfloat16)


def _fc_kernel(h_ref, w_ref, b_ref, pred_ref):
    """One grid step == one output-dim tile of fc_out.

    h_ref:    (B_pad, H_pad)  bf16   top-layer hidden state (resident)
    w_ref:    (H_pad, TN)     bf16   pre-transposed fc weight tile
    b_ref:    (1, TN)         f32
    pred_ref: (B_pad, TN)     f32
    """
    pred_ref[...] = (
        jnp.dot(h_ref[...], w_ref[...], preferred_element_type=jnp.float32)
        + b_ref[...]
    )


# --------------------------------------------------------------------------
# Parameter packing (done once at init: transpose, gate-fuse, pad, cast)
# --------------------------------------------------------------------------
def pack_params(params, emb_dim, hid_dim, n_layers):
    H, E = hid_dim, emb_dim
    V = params["fc_w"].shape[0]
    H_pad = _round_up(H, 128)
    E_pad = _round_up(E, 128)
    K_in = max(E_pad, H_pad)          # common (padded) layer-input width
    V_pad = _round_up(V, 128)
    G = 4 * H_pad

    w_stack, b_stack = [], []
    for l in range(n_layers):
        w_ih = params["w_ih"][l]      # (4H, in_l), in_0 = emb_dim else hid_dim
        w_hh = params["w_hh"][l]      # (4H, H)
        b = params["b"][l]            # (4H,)  (= b_ih + b_hh)
        in_l = w_ih.shape[1]
        w = jnp.zeros((K_in + H_pad, G), jnp.float32)
        bb = jnp.zeros((1, G), jnp.float32)
        for g in range(4):            # gates (i, f, g, o), lane-aligned per gate
            w = w.at[:in_l, g * H_pad:g * H_pad + H].set(w_ih[g * H:(g + 1) * H, :].T)
            w = w.at[K_in:K_in + H, g * H_pad:g * H_pad + H].set(w_hh[g * H:(g + 1) * H, :].T)
            bb = bb.at[0, g * H_pad:g * H_pad + H].set(b[g * H:(g + 1) * H])
        w_stack.append(w.astype(jnp.bfloat16))
        b_stack.append(bb)

    fc_wT = (jnp.zeros((H_pad, V_pad), jnp.float32)
             .at[:H, :V].set(params["fc_w"].T).astype(jnp.bfloat16))
    fc_b = jnp.zeros((1, V_pad), jnp.float32).at[0, :V].set(params["fc_b"])

    return {
        "emb": params["emb"],                 # (V, E) f32 — gathered in glue
        "w_stack": jnp.stack(w_stack),        # (L, K_in + H_pad, 4*H_pad) bf16
        "b_stack": jnp.stack(b_stack),        # (L, 1, 4*H_pad) f32
        "fc_wT": fc_wT,                       # (H_pad, V_pad) bf16
        "fc_b": fc_b,                         # (1, V_pad) f32
    }


# --------------------------------------------------------------------------
# Forward pass
# --------------------------------------------------------------------------
def decoder_forward(inp, hidden, cell, packed):
    """inp: i32[B], hidden/cell: f32[L, B, H] -> (pred[B, V], hidden', cell')."""
    batch = inp.shape[0]
    L, _, hid_dim = hidden.shape
    output_dim, emb_dim = packed["emb"].shape
    H_pad = packed["w_stack"].shape[2] // 4
    K_in = packed["w_stack"].shape[1] - H_pad
    V_pad = packed["fc_wT"].shape[1]
    B_pad = _round_up(batch, 8)

    # --- glue: embedding gather (+ identity dropout), pad to TPU-friendly dims
    # TODO(synk): fuse the gather via PrefetchScalarGridSpec + pl.Element row gather.
    emb = packed["emb"][inp]                                   # (B, E) f32
    emb_p = (jnp.zeros((B_pad, K_in), jnp.bfloat16)
             .at[:batch, :emb_dim].set(emb.astype(jnp.bfloat16)))
    h_p = jnp.zeros((L, B_pad, H_pad), jnp.float32).at[:, :batch, :hid_dim].set(hidden)
    c_p = jnp.zeros((L, B_pad, H_pad), jnp.float32).at[:, :batch, :hid_dim].set(cell)

    # --- stage 1: stacked LSTM cell, grid over layers ------------------------
    h_out_p, c_out_p = pl.pallas_call(
        functools.partial(_lstm_stack_kernel, H_pad, K_in),
        grid=(L,),
        in_specs=[
            pl.BlockSpec((B_pad, K_in), lambda l: (0, 0)),                  # emb (resident)
            pl.BlockSpec((1, B_pad, H_pad), lambda l: (l, 0, 0)),           # hidden[l]
            pl.BlockSpec((1, B_pad, H_pad), lambda l: (l, 0, 0)),           # cell[l]
            pl.BlockSpec((1, K_in + H_pad, 4 * H_pad), lambda l: (l, 0, 0)),  # W[l]
            pl.BlockSpec((1, 1, 4 * H_pad), lambda l: (l, 0, 0)),           # b[l]
        ],
        out_specs=(
            pl.BlockSpec((1, B_pad, H_pad), lambda l: (l, 0, 0)),
            pl.BlockSpec((1, B_pad, H_pad), lambda l: (l, 0, 0)),
        ),
        out_shape=(
            jax.ShapeDtypeStruct((L, B_pad, H_pad), jnp.float32),   # hidden'
            jax.ShapeDtypeStruct((L, B_pad, H_pad), jnp.float32),   # cell'
        ),
        scratch_shapes=[pltpu.VMEM((B_pad, K_in + H_pad), jnp.bfloat16)],
        input_output_aliases={1: 0, 2: 1},                          # in-place state
        compiler_params=pltpu.CompilerParams(dimension_semantics=("arbitrary",)),
    )(emb_p, h_p, c_p, packed["w_stack"], packed["b_stack"])

    # --- stage 2: fc_out, tiled over the padded vocab ------------------------
    h_top = h_out_p[L - 1].astype(jnp.bfloat16)                    # (B_pad, H_pad)
    TN = min(512, V_pad)
    while V_pad % TN:          # V_pad is a multiple of 128, so this terminates
        TN -= 128

    pred_p = pl.pallas_call(
        _fc_kernel,
        grid=(V_pad // TN,),
        in_specs=[
            pl.BlockSpec((B_pad, H_pad), lambda j: (0, 0)),        # h_top (resident)
            pl.BlockSpec((H_pad, TN), lambda j: (0, j)),           # fc_w^T tile
            pl.BlockSpec((1, TN), lambda j: (0, j)),               # fc_b tile
        ],
        out_specs=pl.BlockSpec((B_pad, TN), lambda j: (0, j)),
        out_shape=jax.ShapeDtypeStruct((B_pad, V_pad), jnp.float32),
        compiler_params=pltpu.CompilerParams(dimension_semantics=("parallel",)),
    )(h_top, packed["fc_wT"], packed["fc_b"])

    # --- slice padding back off ----------------------------------------------
    pred = pred_p[:batch, :output_dim]
    h_new = h_out_p[:, :batch, :hid_dim]
    c_new = c_out_p[:, :batch, :hid_dim]
    return pred, h_new, c_new


# --------------------------------------------------------------------------
# Synthetic params (PyTorch nn.Embedding / nn.LSTM / nn.Linear conventions)
# --------------------------------------------------------------------------
def init_params(key, output_dim, emb_dim, hid_dim, n_layers):
    keys = jax.random.split(key, 4 + 4 * n_layers)
    scale = 0.1
    params = {
        "emb": scale * jax.random.normal(keys[0], (output_dim, emb_dim), jnp.float32),
        "fc_w": scale * jax.random.normal(keys[1], (output_dim, hid_dim), jnp.float32),
        "fc_b": scale * jax.random.normal(keys[2], (output_dim,), jnp.float32),
    }
    w_ih, w_hh, b = [], [], []
    for l in range(n_layers):
        in_dim = emb_dim if l == 0 else hid_dim
        k0, k1, k2, k3 = keys[3 + 4 * l: 7 + 4 * l]
        w_ih.append(scale * jax.random.normal(k0, (4 * hid_dim, in_dim), jnp.float32))
        w_hh.append(scale * jax.random.normal(k1, (4 * hid_dim, hid_dim), jnp.float32))
        b.append(scale * (jax.random.normal(k2, (4 * hid_dim,), jnp.float32)
                          + jax.random.normal(k3, (4 * hid_dim,), jnp.float32)))
    params["w_ih"] = w_ih
    params["w_hh"] = w_hh
    params["b"] = b
    return params


def _reference_forward(inp, hidden, cell, params):
    """Pure-JAX reference mirroring the kernel's bf16-matmul / f32-accumulate math."""
    bf = jnp.bfloat16
    x = params["emb"][inp]
    L, _, H = hidden.shape
    h_out, c_out = [], []
    for l in range(L):
        gates = (
            jnp.dot(x.astype(bf), params["w_ih"][l].T.astype(bf),
                    preferred_element_type=jnp.float32)
            + jnp.dot(hidden[l].astype(bf), params["w_hh"][l].T.astype(bf),
                      preferred_element_type=jnp.float32)
            + params["b"][l]
        )
        i = jax.nn.sigmoid(gates[:, 0 * H:1 * H])
        f = jax.nn.sigmoid(gates[:, 1 * H:2 * H])
        g = jnp.tanh(gates[:, 2 * H:3 * H])
        o = jax.nn.sigmoid(gates[:, 3 * H:4 * H])
        c = f * cell[l] + i * g
        h = o * jnp.tanh(c)
        h_out.append(h)
        c_out.append(c)
        x = h
    pred = (jnp.dot(x.astype(bf), params["fc_w"].T.astype(bf),
                    preferred_element_type=jnp.float32) + params["fc_b"])
    return pred, jnp.stack(h_out), jnp.stack(c_out)


if __name__ == "__main__":
    # Small but padding-exercising shapes: emb_dim < 128, batch < 8, vocab not a
    # multiple of 128, layer-0 in_dim != hid_dim.
    output_dim = 1000   # vocab
    emb_dim = 96
    hid_dim = 128
    n_layers = 2
    batch = 5

    key = jax.random.PRNGKey(0)
    k_p, k_i, k_h, k_c = jax.random.split(key, 4)

    params = init_params(k_p, output_dim, emb_dim, hid_dim, n_layers)
    packed = pack_params(params, emb_dim, hid_dim, n_layers)

    inp = jax.random.randint(k_i, (batch,), 0, output_dim, dtype=jnp.int32)
    hidden = 0.1 * jax.random.normal(k_h, (n_layers, batch, hid_dim), jnp.float32)
    cell = 0.1 * jax.random.normal(k_c, (n_layers, batch, hid_dim), jnp.float32)

    fwd = jax.jit(decoder_forward)
    pred, h_new, c_new = fwd(inp, hidden, cell, packed)
    jax.block_until_ready((pred, h_new, c_new))

    # correctness check vs pure-JAX reference (bf16 matmuls, f32 elsewhere)
    pred_r, h_r, c_r = _reference_forward(inp, hidden, cell, params)
    assert pred.shape == (batch, output_dim)
    assert h_new.shape == (n_layers, batch, hid_dim)
    assert c_new.shape == (n_layers, batch, hid_dim)
    assert jnp.allclose(pred, pred_r, atol=3e-3, rtol=3e-3), "prediction mismatch"
    assert jnp.allclose(h_new, h_r, atol=3e-3, rtol=3e-3), "hidden mismatch"
    assert jnp.allclose(c_new, c_r, atol=3e-3, rtol=3e-3), "cell mismatch"

    print("KERNEL_OK")
</pallas_src>

<mosaic_0001>
module attributes {stable_mosaic.version = 11 : i64} {
  func.func @_fc_kernel(%arg0: i32, %arg1: memref<8x128xbf16, #tpu.memory_space<vmem>>, %arg2: memref<128x512xbf16, #tpu.memory_space<vmem>>, %arg3: memref<1x512xf32, #tpu.memory_space<vmem>>, %arg4: memref<8x512xf32, #tpu.memory_space<vmem>>) attributes {dimension_semantics = [#tpu.dimension_semantics<parallel>], iteration_bounds = array<i64: 2>, scalar_prefetch = 0 : i64, scratch_operands = 0 : i64, tpu.core_type = #tpu.core_type<tc>, window_params = [{pipeline_mode = #tpu.pipeline_mode<synchronous>, transform_indices = @transform_0, window_bounds = array<i64: 8, 128>}, {transform_indices = @transform_1, window_bounds = array<i64: 128, 512>}, {transform_indices = @transform_2, window_bounds = array<i64: 1, 512>}, {transform_indices = @transform_3, window_bounds = array<i64: 8, 512>}]} {
    %c0 = arith.constant 0 : index
    %c0_0 = arith.constant 0 : index
    %0 = vector.load %arg1[%c0, %c0_0] : memref<8x128xbf16, #tpu.memory_space<vmem>>, vector<8x128xbf16>
    %c0_1 = arith.constant 0 : index
    %c0_2 = arith.constant 0 : index
    %1 = vector.load %arg2[%c0_1, %c0_2] : memref<128x512xbf16, #tpu.memory_space<vmem>>, vector<128x512xbf16>
    %cst = arith.constant dense<0.000000e+00> : vector<8x512xf32>
    %2 = tpu.matmul %0, %1, %cst {dimension_numbers = #tpu.dot_dimension_numbers<[1], [0], [0], [1], [0, 0, 1, 1], [], []>} : vector<8x128xbf16>, vector<128x512xbf16>, vector<8x512xf32> -> vector<8x512xf32>
    %c0_3 = arith.constant 0 : index
    %c0_4 = arith.constant 0 : index
    %3 = vector.load %arg3[%c0_3, %c0_4] : memref<1x512xf32, #tpu.memory_space<vmem>>, vector<1x512xf32>
    %4 = vector.broadcast %3 : vector<1x512xf32> to vector<8x512xf32>
    %5 = arith.addf %2, %4 : vector<8x512xf32>
    %c0_5 = arith.constant 0 : index
    %c0_6 = arith.constant 0 : index
    %6 = vector.load %arg4[%c0_5, %c0_6] : memref<8x512xf32, #tpu.memory_space<vmem>>, vector<8x512xf32>
    tpu.vector_store %arg4[%c0_5, %c0_6], %5 {strides = array<i32>} : memref<8x512xf32, #tpu.memory_space<vmem>>, vector<8x512xf32>,
    return
  }
  func.func @transform_0(%arg0: i32) -> (i32, i32) {
    %c0_i32 = arith.constant 0 : i32
    %c0_i32_0 = arith.constant 0 : i32
    %c0_i32_1 = arith.constant 0 : i32
    return %c0_i32, %c0_i32_0 : i32, i32
  }
  func.func @transform_1(%arg0: i32) -> (i32, i32) {
    %c0_i32 = arith.constant 0 : i32
    %c0_i32_0 = arith.constant 0 : i32
    return %c0_i32, %arg0 : i32, i32
  }
  func.func @transform_2(%arg0: i32) -> (i32, i32) {
    %c0_i32 = arith.constant 0 : i32
    %c0_i32_0 = arith.constant 0 : i32
    return %c0_i32, %arg0 : i32, i32
  }
  func.func @transform_3(%arg0: i32) -> (i32, i32) {
    %c0_i32 = arith.constant 0 : i32
    %c0_i32_0 = arith.constant 0 : i32
    return %c0_i32, %arg0 : i32, i32
  }
}

module attributes {stable_mosaic.version = 11 : i64} {
  func.func @_lstm_stack_kernel(%arg0: i32, %arg1: memref<8x128xbf16, #tpu.memory_space<vmem>>, %arg2: memref<1x8x128xf32, #tpu.memory_space<vmem>>, %arg3: memref<1x8x128xf32, #tpu.memory_space<vmem>>, %arg4: memref<1x256x512xbf16, #tpu.memory_space<vmem>>, %arg5: memref<1x1x512xf32, #tpu.memory_space<vmem>>, %arg6: memref<1x8x128xf32, #tpu.memory_space<vmem>>, %arg7: memref<1x8x128xf32, #tpu.memory_space<vmem>>, %arg8: memref<8x256xbf16, #tpu.memory_space<vmem>>) attributes {dimension_semantics = [#tpu.dimension_semantics<arbitrary>], iteration_bounds = array<i64: 2>, scalar_prefetch = 0 : i64, scratch_operands = 1 : i64, tpu.core_type = #tpu.core_type<tc>, window_params = [{pipeline_mode = #tpu.pipeline_mode<synchronous>, transform_indices = @transform_0, window_bounds = array<i64: 8, 128>}, {transform_indices = @transform_1, window_bounds = array<i64: 1, 8, 128>}, {transform_indices = @transform_2, window_bounds = array<i64: 1, 8, 128>}, {transform_indices = @transform_3, window_bounds = array<i64: 1, 256, 512>}, {transform_indices = @transform_4, window_bounds = array<i64: 1, 1, 512>}, {transform_indices = @transform_5, window_bounds = array<i64: 1, 8, 128>}, {transform_indices = @transform_6, window_bounds = array<i64: 1, 8, 128>}]} {
    %c0_i32 = arith.constant 0 : i32
    %0 = arith.cmpi eq, %arg0, %c0_i32 : i32
    %1 = arith.extui %0 : i1 to i32
    %c0_i32_0 = arith.constant 0 : i32
    %2 = arith.cmpi ne, %1, %c0_i32_0 : i32
    scf.if %2 {
      %c0_26 = arith.constant 0 : index
      %c0_27 = arith.constant 0 : index
      %50 = vector.load %arg1[%c0_26, %c0_27] : memref<8x128xbf16, #tpu.memory_space<vmem>>, vector<8x128xbf16>
      %c0_28 = arith.constant 0 : index
      %c0_29 = arith.constant 0 : index
      %51 = vector.load %arg8[%c0_28, %c0_29] : memref<8x256xbf16, #tpu.memory_space<vmem>>, vector<8x128xbf16>
      tpu.vector_store %arg8[%c0_28, %c0_29], %50 {strides = array<i32>} : memref<8x256xbf16, #tpu.memory_space<vmem>>, vector<8x128xbf16>,
    } else {
    }
    %c0 = arith.constant 0 : index
    %c0_1 = arith.constant 0 : index
    %c0_2 = arith.constant 0 : index
    %3 = vector.load %arg2[%c0, %c0_1, %c0_2] : memref<1x8x128xf32, #tpu.memory_space<vmem>>, vector<1x8x128xf32>
    %4 = vector.shape_cast %3 : vector<1x8x128xf32> to vector<8x128xf32>
    %5 = arith.truncf %4 : vector<8x128xf32> to vector<8x128xbf16>
    %c0_3 = arith.constant 0 : index
    %c128 = arith.constant 128 : index
    %6 = vector.load %arg8[%c0_3, %c128] : memref<8x256xbf16, #tpu.memory_space<vmem>>, vector<8x128xbf16>
    tpu.vector_store %arg8[%c0_3, %c128], %5 {strides = array<i32>} : memref<8x256xbf16, #tpu.memory_space<vmem>>, vector<8x128xbf16>,
    %c0_4 = arith.constant 0 : index
    %c0_5 = arith.constant 0 : index
    %7 = vector.load %arg8[%c0_4, %c0_5] : memref<8x256xbf16, #tpu.memory_space<vmem>>, vector<8x256xbf16>
    %c0_6 = arith.constant 0 : index
    %c0_7 = arith.constant 0 : index
    %c0_8 = arith.constant 0 : index
    %8 = vector.load %arg4[%c0_6, %c0_7, %c0_8] : memref<1x256x512xbf16, #tpu.memory_space<vmem>>, vector<1x256x512xbf16>
    %9 = vector.shape_cast %8 : vector<1x256x512xbf16> to vector<256x512xbf16>
    %cst = arith.constant dense<0.000000e+00> : vector<8x512xf32>
    %10 = tpu.matmul %7, %9, %cst {dimension_numbers = #tpu.dot_dimension_numbers<[1], [0], [0], [1], [0, 0, 1, 1], [], []>} : vector<8x256xbf16>, vector<256x512xbf16>, vector<8x512xf32> -> vector<8x512xf32>
    %c0_9 = arith.constant 0 : index
    %c0_10 = arith.constant 0 : index
    %c0_11 = arith.constant 0 : index
    %11 = vector.load %arg5[%c0_9, %c0_10, %c0_11] : memref<1x1x512xf32, #tpu.memory_space<vmem>>, vector<1x1x512xf32>
    %12 = vector.shape_cast %11 : vector<1x1x512xf32> to vector<1x512xf32>
    %13 = vector.broadcast %12 : vector<1x512xf32> to vector<8x512xf32>
    %14 = arith.addf %10, %13 : vector<8x512xf32>
    %15 = vector.extract_strided_slice %14 {offsets = [0, 0], sizes = [8, 128], strides = [1, 1]} : vector<8x512xf32> to vector<8x128xf32>
    %16 = arith.negf %15 : vector<8x128xf32>
    %17 = math.exp %16 : vector<8x128xf32>
    %cst_12 = arith.constant 1.000000e+00 : f32
    %18 = vector.broadcast %cst_12 : f32 to vector<8x128xf32>
    %19 = arith.addf %18, %17 : vector<8x128xf32>
    %20 = arith.divf %18, %19 : vector<8x128xf32>
    %21 = vector.extract_strided_slice %14 {offsets = [0, 128], sizes = [8, 128], strides = [1, 1]} : vector<8x512xf32> to vector<8x128xf32>
    %22 = arith.negf %21 : vector<8x128xf32>
    %23 = math.exp %22 : vector<8x128xf32>
    %cst_13 = arith.constant 1.000000e+00 : f32
    %24 = vector.broadcast %cst_13 : f32 to vector<8x128xf32>
    %25 = arith.addf %24, %23 : vector<8x128xf32>
    %26 = arith.divf %24, %25 : vector<8x128xf32>
    %27 = vector.extract_strided_slice %14 {offsets = [0, 256], sizes = [8, 128], strides = [1, 1]} : vector<8x512xf32> to vector<8x128xf32>
    %28 = math.tanh %27 : vector<8x128xf32>
    %29 = vector.extract_strided_slice %14 {offsets = [0, 384], sizes = [8, 128], strides = [1, 1]} : vector<8x512xf32> to vector<8x128xf32>
    %30 = arith.negf %29 : vector<8x128xf32>
    %31 = math.exp %30 : vector<8x128xf32>
    %cst_14 = arith.constant 1.000000e+00 : f32
    %32 = vector.broadcast %cst_14 : f32 to vector<8x128xf32>
    %33 = arith.addf %32, %31 : vector<8x128xf32>
    %34 = arith.divf %32, %33 : vector<8x128xf32>
    %c0_15 = arith.constant 0 : index
    %c0_16 = arith.constant 0 : index
    %c0_17 = arith.constant 0 : index
    %35 = vector.load %arg3[%c0_15, %c0_16, %c0_17] : memref<1x8x128xf32, #tpu.memory_space<vmem>>, vector<1x8x128xf32>
    %36 = vector.shape_cast %35 : vector<1x8x128xf32> to vector<8x128xf32>
    %37 = arith.mulf %26, %36 : vector<8x128xf32>
    %38 = arith.mulf %20, %28 : vector<8x128xf32>
    %39 = arith.addf %37, %38 : vector<8x128xf32>
    %40 = math.tanh %39 : vector<8x128xf32>
    %41 = arith.mulf %34, %40 : vector<8x128xf32>
    %c0_18 = arith.constant 0 : index
    %c0_19 = arith.constant 0 : index
    %c0_20 = arith.constant 0 : index
    %42 = vector.load %arg6[%c0_18, %c0_19, %c0_20] : memref<1x8x128xf32, #tpu.memory_space<vmem>>, vector<1x8x128xf32>
    %43 = vector.shape_cast %42 : vector<1x8x128xf32> to vector<8x128xf32>
    %44 = vector.shape_cast %41 : vector<8x128xf32> to vector<1x8x128xf32>
    tpu.vector_store %arg6[%c0_18, %c0_19, %c0_20], %44 {strides = array<i32>} : memref<1x8x128xf32, #tpu.memory_space<vmem>>, vector<1x8x128xf32>,
    %c0_21 = arith.constant 0 : index
    %c0_22 = arith.constant 0 : index
    %c0_23 = arith.constant 0 : index
    %45 = vector.load %arg7[%c0_21, %c0_22, %c0_23] : memref<1x8x128xf32, #tpu.memory_space<vmem>>, vector<1x8x128xf32>
    %46 = vector.shape_cast %45 : vector<1x8x128xf32> to vector<8x128xf32>
    %47 = vector.shape_cast %39 : vector<8x128xf32> to vector<1x8x128xf32>
    tpu.vector_store %arg7[%c0_21, %c0_22, %c0_23], %47 {strides = array<i32>} : memref<1x8x128xf32, #tpu.memory_space<vmem>>, vector<1x8x128xf32>,
    %48 = arith.truncf %41 : vector<8x128xf32> to vector<8x128xbf16>
    %c0_24 = arith.constant 0 : index
    %c0_25 = arith.constant 0 : index
    %49 = vector.load %arg8[%c0_24, %c0_25] : memref<8x256xbf16, #tpu.memory_space<vmem>>, vector<8x128xbf16>
    tpu.vector_store %arg8[%c0_24, %c0_25], %48 {strides = array<i32>} : memref<8x256xbf16, #tpu.memory_space<vmem>>, vector<8x128xbf16>,
    return
  }
  func.func @transform_0(%arg0: i32) -> (i32, i32) {
    %c0_i32 = arith.constant 0 : i32
    %c0_i32_0 = arith.constant 0 : i32
    %c0_i32_1 = arith.constant 0 : i32
    return %c0_i32, %c0_i32_0 : i32, i32
  }
  func.func @transform_1(%arg0: i32) -> (i32, i32, i32) {
    %c0_i32 = arith.constant 0 : i32
    %c0_i32_0 = arith.constant 0 : i32
    %c0_i32_1 = arith.constant 0 : i32
    return %arg0, %c0_i32, %c0_i32_0 : i32, i32, i32
  }
  func.func @transform_2(%arg0: i32) -> (i32, i32, i32) {
    %c0_i32 = arith.constant 0 : i32
    %c0_i32_0 = arith.constant 0 : i32
    %c0_i32_1 = arith.constant 0 : i32
    return %arg0, %c0_i32, %c0_i32_0 : i32, i32, i32
  }
  func.func @transform_3(%arg0: i32) -> (i32, i32, i32) {
    %c0_i32 = arith.constant 0 : i32
    %c0_i32_0 = arith.constant 0 : i32
    %c0_i32_1 = arith.constant 0 : i32
    return %arg0, %c0_i32, %c0_i32_0 : i32, i32, i32
  }
  func.func @transform_4(%arg0: i32) -> (i32, i32, i32) {
    %c0_i32 = arith.constant 0 : i32
    %c0_i32_0 = arith.constant 0 : i32
    %c0_i32_1 = arith.constant 0 : i32
    return %arg0, %c0_i32, %c0_i32_0 : i32, i32, i32
  }
  func.func @transform_5(%arg0: i32) -> (i32, i32, i32) {
    %c0_i32 = arith.constant 0 : i32
    %c0_i32_0 = arith.constant 0 : i32
    %c0_i32_1 = arith.constant 0 : i32
    return %arg0, %c0_i32, %c0_i32_0 : i32, i32, i32
  }
  func.func @transform_6(%arg0: i32) -> (i32, i32, i32) {
    %c0_i32 = arith.constant 0 : i32
    %c0_i32_0 = arith.constant 0 : i32
    %c0_i32_1 = arith.constant 0 : i32
    return %arg0, %c0_i32, %c0_i32_0 : i32, i32, i32
  }
}

</mosaic_0001>

<bundles_post_ra>
// kernel: decoder_forward.3
= control target key start
LH: loop header
LB: loop body
LE: loop exit
PB: predicated region body
PF: predicated region fallthrough
CT: control target
= control target key end

     0   :  { %8 = vsyncpa [#allocation4], 0  ;;  %s1105_s0 = inlined_call_operand.vmem [shape: bf16[8,128], index: 0, kind: input, shape index: {}]   ;;  %s1106_s1 = inlined_call_operand.vmem [shape: bf16[128,1024], index: 1, kind: input, shape index: {}]   ;;  %s1107_s2 = inlined_call_operand.vmem [shape: f32[1,1024], index: 2, kind: input, shape index: {}]   ;;  %s1108_s3 = inlined_call_operand.hbm [shape: f32[8,1024], index: 3, kind: output, shape index: {}]  }
   0x1   :  { %10 = vsyncpa [#allocation4 + $0x1], 0  ;;  %s886_s12 = smov 0   ;;  %s888_s13 = smov 0  }
   0x2   :  { %s890_s14 = smov 0   ;;  %s892_s15 = smov 0  }
   0x3 LB: > { %s907_s16 = sadd.s32 4294967295, %s862_s15   ;;  %s663_s17 = sadd.s32 4294967294, %s862_s15   ;;  %s862_s15 = sphi %s892_s15, %s1114_s15   ;;  %s858_s14 = sphi %s890_s14, %s1113_s14   ;;  %s854_s13 = sphi %s888_s13, %s1112_s13   ;;  %s850_s12 = sphi %s886_s12, %s1111_s12  }
   0x4   : > { %s911_s18 = sadd.s32 1, %s862_s15   ;;  %s44_s19 = sadd.s32 1, %s858_s14 }
   0x5   : > { %s41_s20 = ssub.s32 %s862_s15, %s911_s18  ;;  %p51_p0 = scmp.ne.s32.totalorder %s858_s14, %s854_s13 }
   0x6   : > { %p42_p1 = scmp.eq.s32.totalorder %s41_s20, 0  ;;  %p52_p2 = scmp.eq.s32.totalorder %s862_s15, 0 }
   0x7   : > { %p107_p3 = scmp.eq.s32.totalorder %s907_s16, 1  ;;  %p112_p4 = scmp.ne.s32.totalorder %s854_s13, %s850_s12 }
   0x8   : > { %s923_s21 = scalar_select %p42_p1, %s858_s14, %s44_s19  }
   0x9   : > { %p53_p5 = por %p52_p2, %p51_p0  ;;  %p925_p6 = por %p107_p3, %p51_p0 }
   0xa   : > { %p113_p7 = scmp.eq.s32.totalorder %s663_s17, 1  ;;  %p665_p9 = scmp.ge.s32.totalorder %s862_s15, 2 }
   0xc   : > { %p929_p8 = por %p113_p7, %p112_p4  ;;  %132 = sbr.rel (%p665_p9) target bundleno = 39 (0x27), region = 20 }
  0x13   : > { %135 = sbr.rel (!%p53_p5) target bundleno = 39 (0x27), region = 24  ;;  %s137_s24 = sand.u32 (%p53_p5), 1, %s858_s14  }
  0x14   : > { %s710_s25 = sshll.u32 (%p53_p5), %s862_s15, 4  ;;  %s666_s26 = sshll.u32 (%p53_p5), %s137_s24, 8 }
  0x15   : > { %s941_s29 = scalar_lea.vmem (%p53_p5), %s1106_s1, %s710_s25  ;;  %s946_s30 = scalar_lea.vmem (%p53_p5), [#allocation2], %s666_s26 }
  0x16   : > { %v155_v0 = vld [vmem:[%s941_s29] sm:$0xff] (%p53_p5)  ;;  %v157_v1 = vld [vmem:[%s941_s29 + $0x8] sm:$0xff] (%p53_p5) }
  0x17   : > { %v159_v2 = vld [vmem:[%s941_s29 + $0x20] sm:$0xff] (%p53_p5)  ;;  %156 = vst [vmem:[%s946_s30] sm:$0xff] (%p53_p5), %v155_v0  ;;  %158 = vst [vmem:[%s946_s30 + $0x8] sm:$0xff] (%p53_p5), %v157_v1  ;;  %v161_v3 = vld [vmem:[%s941_s29 + $0x28] sm:$0xff] (%p53_p5) }
  0x18   : > { %160 = vst [vmem:[%s946_s30 + $0x10] sm:$0xff] (%p53_p5), %v159_v2  ;;  %v163_v4 = vld [vmem:[%s941_s29 + $0x40] sm:$0xff] (%p53_p5)  ;;  %v165_v5 = vld [vmem:[%s941_s29 + $0x48] sm:$0xff] (%p53_p5)  ;;  %162 = vst [vmem:[%s946_s30 + $0x18] sm:$0xff] (%p53_p5), %v161_v3 }
  0x19   : > { %164 = vst [vmem:[%s946_s30 + $0x20] sm:$0xff] (%p53_p5), %v163_v4  ;;  %166 = vst [vmem:[%s946_s30 + $0x28] sm:$0xff] (%p53_p5), %v165_v5  ;;  %v167_v6 = vld [vmem:[%s941_s29 + $0x60] sm:$0xff] (%p53_p5)  ;;  %v169_v7 = vld [vmem:[%s941_s29 + $0x68] sm:$0xff] (%p53_p5) }
  0x1a   : > { %v171_v8 = vld [vmem:[%s941_s29 + $0x80] sm:$0xff]  ;;  %168 = vst [vmem:[%s946_s30 + $0x30] sm:$0xff] %v167_v6  ;;  %170 = vst [vmem:[%s946_s30 + $0x38] sm:$0xff] %v169_v7  ;;  %v173_v9 = vld [vmem:[%s941_s29 + $0x88] sm:$0xff] }
  0x1b   : > { %172 = vst [vmem:[%s946_s30 + $0x40] sm:$0xff] %v171_v8  ;;  %v175_v10 = vld [vmem:[%s941_s29 + $0xa0] sm:$0xff]  ;;  %v177_v11 = vld [vmem:[%s941_s29 + $0xa8] sm:$0xff]  ;;  %174 = vst [vmem:[%s946_s30 + $0x48] sm:$0xff] %v173_v9 }
  0x1c   : > { %176 = vst [vmem:[%s946_s30 + $0x50] sm:$0xff] %v175_v10  ;;  %178 = vst [vmem:[%s946_s30 + $0x58] sm:$0xff] %v177_v11  ;;  %v179_v12 = vld [vmem:[%s941_s29 + $0xc0] sm:$0xff]  ;;  %v181_v13 = vld [vmem:[%s941_s29 + $0xc8] sm:$0xff] }
  0x1d   : > { %v183_v14 = vld [vmem:[%s941_s29 + $0xe0] sm:$0xff]  ;;  %180 = vst [vmem:[%s946_s30 + $0x60] sm:$0xff] %v179_v12  ;;  %182 = vst [vmem:[%s946_s30 + $0x68] sm:$0xff] %v181_v13  ;;  %v185_v15 = vld [vmem:[%s941_s29 + $0xe8] sm:$0xff] }
  0x1e   : > { %184 = vst [vmem:[%s946_s30 + $0x70] sm:$0xff] %v183_v14  ;;  %v187_v16 = vld [vmem:[%s941_s29 + $0x100] sm:$0xff]  ;;  %v189_v17 = vld [vmem:[%s941_s29 + $0x108] sm:$0xff]  ;;  %186 = vst [vmem:[%s946_s30 + $0x78] sm:$0xff] %v185_v15 }
  0x1f   : > { %188 = vst [vmem:[%s946_s30 + $0x80] sm:$0xff] %v187_v16  ;;  %190 = vst [vmem:[%s946_s30 + $0x88] sm:$0xff] %v189_v17  ;;  %v191_v18 = vld [vmem:[%s941_s29 + $0x120] sm:$0xff]  ;;  %v193_v19 = vld [vmem:[%s941_s29 + $0x128] sm:$0xff] }
  0x20   : > { %v195_v20 = vld [vmem:[%s941_s29 + $0x140] sm:$0xff]  ;;  %192 = vst [vmem:[%s946_s30 + $0x90] sm:$0xff] %v191_v18  ;;  %194 = vst [vmem:[%s946_s30 + $0x98] sm:$0xff] %v193_v19  ;;  %v197_v21 = vld [vmem:[%s941_s29 + $0x148] sm:$0xff] }
  0x21   : > { %196 = vst [vmem:[%s946_s30 + $0xa0] sm:$0xff] %v195_v20  ;;  %v199_v22 = vld [vmem:[%s941_s29 + $0x160] sm:$0xff]  ;;  %v201_v23 = vld [vmem:[%s941_s29 + $0x168] sm:$0xff]  ;;  %198 = vst [vmem:[%s946_s30 + $0xa8] sm:$0xff] %v197_v21 }
  0x22   : > { %200 = vst [vmem:[%s946_s30 + $0xb0] sm:$0xff] %v199_v22  ;;  %202 = vst [vmem:[%s946_s30 + $0xb8] sm:$0xff] %v201_v23  ;;  %v203_v24 = vld [vmem:[%s941_s29 + $0x180] sm:$0xff]  ;;  %v205_v25 = vld [vmem:[%s941_s29 + $0x188] sm:$0xff] }
  0x23   : > { %v207_v26 = vld [vmem:[%s941_s29 + $0x1a0] sm:$0xff]  ;;  %204 = vst [vmem:[%s946_s30 + $0xc0] sm:$0xff] %v203_v24  ;;  %206 = vst [vmem:[%s946_s30 + $0xc8] sm:$0xff] %v205_v25  ;;  %v209_v27 = vld [vmem:[%s941_s29 + $0x1a8] sm:$0xff] }
  0x24   : > { %208 = vst [vmem:[%s946_s30 + $0xd0] sm:$0xff] %v207_v26  ;;  %v211_v28 = vld [vmem:[%s941_s29 + $0x1c0] sm:$0xff]  ;;  %v213_v29 = vld [vmem:[%s941_s29 + $0x1c8] sm:$0xff]  ;;  %210 = vst [vmem:[%s946_s30 + $0xd8] sm:$0xff] %v209_v27 }
  0x25   : > { %212 = vst [vmem:[%s946_s30 + $0xe0] sm:$0xff] %v211_v28  ;;  %214 = vst [vmem:[%s946_s30 + $0xe8] sm:$0xff] %v213_v29  ;;  %v215_v30 = vld [vmem:[%s941_s29 + $0x1e0] sm:$0xff]  ;;  %v217_v31 = vld [vmem:[%s941_s29 + $0x1e8] sm:$0xff] }
  0x26   : > { %216 = vst [vmem:[%s946_s30 + $0xf0] sm:$0xff] %v215_v30  ;;  %218 = vst [vmem:[%s946_s30 + $0xf8] sm:$0xff] %v217_v31 }
  0x27 PF: > { %p669_p10 = scmp.ge.s32.totalorder %s862_s15, 1  ;;  %p231_p11 = scmp.lt.s32.totalorder %s862_s15, 3 }
  0x29   : > { %p232_p12 = pnand %p669_p10, %p231_p11 }
  0x2a   : > { %s1012_s4 = sand.u32 (!%p232_p12), 1, %s854_s13   ;;  %v864_v32 = vmov (!%p232_p12), 0   ;;  %v273_v1 = vld [vmem:[%s1105_s0] sm:$0xf] (!%p232_p12)  ;;  %s672_s9 = sshll.u32 (!%p232_p12), %s907_s16, 2  ;;  %v308_v2 = vlaneseq (!%p232_p12) }
  0x2b   : > { %235 = sbr.rel (%p232_p12) target bundleno = 307 (0x133), region = 51  ;;  %s670_s5 = sshll.u32 (!%p232_p12), %s1012_s4, 8  ;;  %520 = vmatprep.mubr.bf16.mxu0 (!%p232_p12), %v864_v32  ;;  %561 = vmatprep.mubr.bf16.mxu1 (!%p232_p12), %v864_v32 }
  0x2c   : > { %s1015_s6 = scalar_lea.vmem (!%p232_p12), [#allocation2], %s670_s5  ;;  %p267_p13 = scmp.lt.s32.totalorder (!%p232_p12), %s672_s9, 7  ;;  %v309_v3 = vshrl.u32 (!%p232_p12), %v308_v2, 7 }
  0x2d   : > { %v752_v33 = vld [vmem:[%s1015_s6 + $0x4] ss:$16 sps:$4 sm:$0xff] (!%p232_p12)   ;;  %v754_v34 = vld [vmem:[%s1015_s6 + $0xc] ss:$16 sps:$4 sm:$0xff] (!%p232_p12)   ;;  %v756_v35 = vld [vmem:[%s1015_s6] ss:$16 sps:$4 sm:$0xff] (!%p232_p12)  }
  0x2e   : > { %488 = vmatprep.subr.bf16.mxu0 (!%p232_p12), %v752_v33  ;;  %v757_v36 = vld [vmem:[%s1015_s6 + $0x8] ss:$16 sps:$4 sm:$0xff] (!%p232_p12)   ;;  %529 = vmatprep.subr.bf16.mxu1 (!%p232_p12), %v754_v34  ;;  %v758_v37 = vld [vmem:[%s1015_s6 + $0x24] ss:$16 sps:$4 sm:$0xff] (!%p232_p12)   ;;  %v760_v38 = vld [vmem:[%s1015_s6 + $0x2c] ss:$16 sps:$4 sm:$0xff] (!%p232_p12)  }
  0x2f   : > { %489 = vmatpush1.bf16.msra.mxu0 (!%p232_p12), %v756_v35  ;;  %530 = vmatpush1.bf16.msra.mxu1 (!%p232_p12), %v757_v36  ;;  %v762_v39 = vld [vmem:[%s1015_s6 + $0x20] ss:$16 sps:$4 sm:$0xff] (!%p232_p12)   ;;  %v763_v40 = vld [vmem:[%s1015_s6 + $0x28] ss:$16 sps:$4 sm:$0xff] (!%p232_p12)   ;;  %v764_v41 = vld [vmem:[%s1015_s6 + $0x44] ss:$16 sps:$4 sm:$0xff] (!%p232_p12)  }
  0x30   : > { %490 = vmatprep.subr.bf16.mxu0 (!%p232_p12), %v758_v37  ;;  %531 = vmatprep.subr.bf16.mxu1 (!%p232_p12), %v760_v38  ;;  %v766_v42 = vld [vmem:[%s1015_s6 + $0x4c] ss:$16 sps:$4 sm:$0xff] (!%p232_p12)   ;;  %v768_v43 = vld [vmem:[%s1015_s6 + $0x40] ss:$16 sps:$4 sm:$0xff] (!%p232_p12)   ;;  %v769_v44 = vld [vmem:[%s1015_s6 + $0x48] ss:$16 sps:$4 sm:$0xff] (!%p232_p12)  }
  0x31   : > { %v770_v45 = vld [vmem:[%s1015_s6 + $0x64] ss:$16 sps:$4 sm:$0xff] (!%p232_p12)   ;;  %v772_v46 = vld [vmem:[%s1015_s6 + $0x6c] ss:$16 sps:$4 sm:$0xff] (!%p232_p12)   ;;  %v774_v47 = vld [vmem:[%s1015_s6 + $0x60] ss:$16 sps:$4 sm:$0xff] (!%p232_p12)  }
  0x32   : > { %v775_v48 = vld [vmem:[%s1015_s6 + $0x68] ss:$16 sps:$4 sm:$0xff]   ;;  %v776_v49 = vld [vmem:[%s1015_s6 + $0x84] ss:$16 sps:$4 sm:$0xff]   ;;  %v778_v50 = vld [vmem:[%s1015_s6 + $0x8c] ss:$16 sps:$4 sm:$0xff]  }
  0x33   : > { %491 = vmatpush1.bf16.msra.mxu0 %v762_v39  ;;  %532 = vmatpush1.bf16.msra.mxu1 %v763_v40  ;;  %v780_v51 = vld [vmem:[%s1015_s6 + $0x80] ss:$16 sps:$4 sm:$0xff]   ;;  %v781_v52 = vld [vmem:[%s1015_s6 + $0x88] ss:$16 sps:$4 sm:$0xff]   ;;  %v782_v53 = vld [vmem:[%s1015_s6 + $0xa4] ss:$16 sps:$4 sm:$0xff]  }
  0x34   : > { %492 = vmatprep.subr.bf16.mxu0 %v764_v41  ;;  %533 = vmatprep.subr.bf16.mxu1 %v766_v42  ;;  %v784_v54 = vld [vmem:[%s1015_s6 + $0xac] ss:$16 sps:$4 sm:$0xff]   ;;  %v786_v55 = vld [vmem:[%s1015_s6 + $0xa0] ss:$16 sps:$4 sm:$0xff]   ;;  %v787_v56 = vld [vmem:[%s1015_s6 + $0xa8] ss:$16 sps:$4 sm:$0xff]  }
  0x35   : > { %v788_v57 = vld [vmem:[%s1015_s6 + $0xc4] ss:$16 sps:$4 sm:$0xff]   ;;  %v790_v58 = vld [vmem:[%s1015_s6 + $0xcc] ss:$16 sps:$4 sm:$0xff]   ;;  %v792_v59 = vld [vmem:[%s1015_s6 + $0xc0] ss:$16 sps:$4 sm:$0xff]  }
  0x36   : > { %v793_v60 = vld [vmem:[%s1015_s6 + $0xc8] ss:$16 sps:$4 sm:$0xff]   ;;  %v794_v61 = vld [vmem:[%s1015_s6 + $0xe4] ss:$16 sps:$4 sm:$0xff]   ;;  %v796_v62 = vld [vmem:[%s1015_s6 + $0xec] ss:$16 sps:$4 sm:$0xff]  }
  0x37   : > { %493 = vmatpush1.bf16.msra.mxu0 %v768_v43  ;;  %534 = vmatpush1.bf16.msra.mxu1 %v769_v44  ;;  %v798_v63 = vld [vmem:[%s1015_s6 + $0xe0] ss:$16 sps:$4 sm:$0xff]   ;;  %v799_v0 = vld [vmem:[%s1015_s6 + $0xe8] ss:$16 sps:$4 sm:$0xff]   ;;  %s1116_s9 = smov (!%p267_p13, %s672_s9), 7  ;;  %s671_s19 = sshll.u32 %s1012_s4, 5 }
  0x38   : > { %494 = vmatprep.subr.bf16.mxu0 %v770_v45  ;;  %535 = vmatprep.subr.bf16.mxu1 %v772_v46  ;;  %s269_s17 = scalar_lea.vmem %s1107_s2, %s1116_s9  ;;  %v310_v4 = vsub.s32 0, %v309_v3  ;;  %v318_v5 = vsub.s32 2, %v309_v3  ;;  %v314_v7 = vsub.s32 1, %v309_v3  ;;  %v322_v8 = vsub.s32 3, %v309_v3  ;;  %s711_s20 = sshll.u32 %s907_s16, 9 }
  0x39   : > { %v306_v6 = vld [vmem:[%s269_s17] sm:$0xf]  ;;  %s264_s24 = scalar_lea.vmem [#allocation3], %s671_s19  ;;  %s1061_s28 = scalar_lea.hbm %s1108_s3, %s711_s20 }
  0x3a   : > { %v311_v9 = vrot.slane %v306_v6, %v310_v4  ;;  %v319_v10 = vrot.slane %v306_v6, %v318_v5  ;;  %v315_v11 = vrot.slane %v306_v6, %v314_v7  ;;  %v323_v12 = vrot.slane %v306_v6, %v322_v8  ;;  %s589_s25 = sshll.u32 %s264_s24, 4  ;;  %s575_s16 = scalar_lea.sflag [#allocation4], %s1012_s4  ;;  %s1063_s25 = int_to_ptr.vmem [resolvable:$true] %s589_s25 }
  0x3b   : > { %495 = vmatpush1.bf16.msra.mxu0 %v774_v47  ;;  %536 = vmatpush1.bf16.msra.mxu1 %v775_v48  ;;  %s800_s29 = scalar_lea.vmem %s1063_s25, 512  ;;  %s865_s30 = smov [#allocation3]  }
  0x3c   : > { %496 = vmatprep.subr.bf16.mxu0 %v776_v49  ;;  %537 = vmatprep.subr.bf16.mxu1 %v778_v50  ;;  %p801_p0 = scmp.ne.s32.totalorder %s1063_s25, %s800_s29  ;;  %s804_s5 = sshll.u32 %s865_s30, 4  ;;  %s805_s5 = int_to_ptr.vmem [resolvable:$false] %s804_s5 }
  0x3d   : > { %s806_s6 = scalar_lea.vmem %s805_s5, 1024  ;;  %p807_p3 = scmp.lt.s32.totalorder %s1063_s25, %s805_s5 }
  0x3e   : > { %p802_p1 = pnand %p801_p0, %p925_p6  ;;  %p808_p4 = scmp.lt.s32.totalorder %s806_s6, %s800_s29 }
  0x3f   : > { %497 = vmatpush1.bf16.msra.mxu0 %v780_v51  ;;  %538 = vmatpush1.bf16.msra.mxu1 %v781_v52 }
  0x40   : > { %498 = vmatprep.subr.bf16.mxu0 %v782_v53  ;;  %539 = vmatprep.subr.bf16.mxu1 %v784_v54  ;;  %p803_p2 = pneg %p802_p1  ;;  %p809_p5 = por %p808_p4, %p807_p3 }
  0x42   : > { %p810_p7 = pnand %p809_p5, %p803_p2 }
  0x43   : > { %499 = vmatpush1.bf16.msra.mxu0 %v786_v55  ;;  %540 = vmatpush1.bf16.msra.mxu1 %v787_v56 }
  0x44   : > { %500 = vmatprep.subr.bf16.mxu0 %v788_v57  ;;  %541 = vmatprep.subr.bf16.mxu1 %v790_v58 }
  0x47   : > { %501 = vmatpush1.bf16.msra.mxu0 %v792_v59  ;;  %542 = vmatpush1.bf16.msra.mxu1 %v793_v60 }
  0x48   : > { %502 = vmatprep.subr.bf16.mxu0 %v794_v61  ;;  %543 = vmatprep.subr.bf16.mxu1 %v796_v62 }
  0x4b   : > { %503 = vmatpush1.bf16.msra.mxu0 %v798_v63  ;;  %544 = vmatpush1.bf16.msra.mxu1 %v799_v0 }
  0x4e   : > { %521 = vmatmul.mubr.bf16.vlgmr.msra.gmra.mrb[0].mxu0 %v273_v1  ;;  %562 = vmatmul.mubr.bf16.vlgmr.msra.gmra.mrb[0].mxu1 %v273_v1 }
 0x121   : > { %v522_v13 = vpop.f32.mrb[0].mxu0  ;;  %v563_v14 = vpop.f32.mrb[0].mxu1 }
 0x122   : > { %v523_v15 = vadd.f32 %v522_v13, %v311_v9  ;;  %v564_v16 = vadd.f32 %v563_v14, %v319_v10  ;;  %v524_v17 = vpop.f32.mrb[1].mxu0  ;;  %v565_v18 = vpop.f32.mrb[1].mxu1 }
 0x123   : > { %v525_v19 = vadd.f32 %v524_v17, %v315_v11  ;;  %v566_v20 = vadd.f32 %v565_v18, %v323_v12  ;;  %v526_v21 = vpop.f32.mrb[2].mxu0  ;;  %v567_v22 = vpop.f32.mrb[2].mxu1 }
 0x124   : > { %570 = vst [vmem:[%s264_s24] sm:$0xff] %v523_v15  ;;  %572 = vst [vmem:[%s264_s24 + $0x10] sm:$0xff] %v564_v16  ;;  %v527_v23 = vpop.f32.mrb[3].mxu0  ;;  %v568_v24 = vpop.f32.mrb[3].mxu1 }
 0x125   : > { %571 = vst [vmem:[%s264_s24 + $0x8] sm:$0xff] %v525_v19  ;;  %573 = vst [vmem:[%s264_s24 + $0x18] sm:$0xff] %v566_v20 }
 0x126   : > { %813 = shalt.err (!%p810_p7)
}
 0x127   : > { %s814_s4 = scalar_lea.hbm %s1061_s28, 512  ;;  %s818_s9 = scalar_lea.hbm %s1108_s3, 1024 }
 0x128   : > { %p815_p10 = scmp.ne.s32.totalorder %s1061_s28, %s814_s4  ;;  %p819_p13 = scmp.lt.u32.totalorder %s1061_s28, %s1108_s3 }
 0x129   : > { %p820_p0 = scmp.lt.u32.totalorder %s818_s9, %s814_s4  ;;  %p822_p2 = scmp.lt.u32.totalorder %s814_s4, %s1061_s28 }
 0x12a   : > { %p816_p11 = pnand %p815_p10, %p925_p6 }
 0x12b   : > { %p821_p1 = por %p820_p0, %p819_p13 }
 0x12c   : > { %p817_p12 = pneg %p816_p11 }
 0x12d   : > { %p823_p3 = por %p822_p2, %p821_p1 }
 0x12f   : > { %p824_p4 = pnand %p823_p3, %p817_p12 }
 0x131   : > { %827 = shalt.err (!%p824_p4)
}
 0x132   : > { %712 = dma.vmem_to_hbm [thread:$0]  (%p925_p6), %s1063_s25, 512, %s1061_s28, %s575_s16  }
 0x133 PF: > { %s601_s17 = sand.u32 1, %s850_s12   ;;  %p715_p5 = pnand %p665_p9, %p929_p8 }
 0x134   : > { %s602_s19 = scalar_lea.sflag [#allocation4], %s601_s17 }
 0x135   : > { %845 = dma.done.wait (!%p715_p5), %s602_s19, 512  }
 0x136   : > { %847 = vsyncadd (!%p715_p5), %s602_s19, 4294966784  ;;  %p13_p7 = scmp.ge.s32.totalorder %s911_s18, 4   ;;  %s1111_s12 = smov %s854_s13 }
 0x137   : > { %s1112_s13 = smov %s858_s14  ;;  %s1113_s14 = smov %s923_s21 }
 0x138   : > { %s1114_s15 = smov %s911_s18  ;;  %15 = sbr.rel (!%p13_p7) target bundleno = 3 (0x3), region = 98 }
 0x13f   :  { %607 = vsyncpa [#allocation4], 1 }
 0x140   :  { %609 = vsyncpa [#allocation4 + $0x1], 1 }

// kernel: decoder_forward.2
= control target key start
LH: loop header
LB: loop body
LE: loop exit
PB: predicated region body
PF: predicated region fallthrough
CT: control target
= control target key end

     0   :  { %s1216_s21 = smov 0   ;;  %s1343_s0 = inlined_call_operand.vmem [shape: bf16[8,128], index: 0, kind: input, shape index: {}]   ;;  %s1344_s1 = inlined_call_operand.vmem [shape: f32[2,8,128], index: 1, kind: input, shape index: {}, may-alias: {1,5}]   ;;  %s1345_s2 = inlined_call_operand.vmem [shape: f32[2,8,128], index: 2, kind: input, shape index: {}, may-alias: {2,6}]   ;;  %s1346_s3 = inlined_call_operand.vmem [shape: bf16[2,256,512], index: 3, kind: input, shape index: {}]   ;;  %s1347_s4 = inlined_call_operand.vmem [shape: f32[2,1,512], index: 4, kind: input, shape index: {}]   ;;  %s1348_s5 = inlined_call_operand.vmem [shape: f32[2,8,128], index: 5, kind: output, shape index: {0}, may-alias: {1,5}]   ;;  %s1349_s6 = inlined_call_operand.vmem [shape: f32[2,8,128], index: 6, kind: output, shape index: {1}, may-alias: {2,6}]  }
   0x1 LB: > { %s966_s22 = sadd.s32 4294967295, %s1179_s21   ;;  %p970_p0 = scmp.ge.s32.totalorder %s1179_s21, 1  ;;  %s1179_s21 = sphi %s1216_s21, %s17_s21  }
   0x2   : > { %p242_p1 = scmp.lt.s32.totalorder %s1179_s21, 3 }
   0x4   : > { %p243_p2 = pnand %p970_p0, %p242_p1 }
   0x5   : > { %p287_p3 = scmp.lt.s32.totalorder (!%p243_p2), %s966_s22, 1  ;;  %p978_p4 = scmp.ne.s32.totalorder (!%p243_p2), %s966_s22, 0 }
   0x6   : > { %246 = sbr.rel (%p243_p2) target bundleno = 347 (0x15b), region = 40 }
   0xd   : > { %s288_s23 = scalar_select %p287_p3, %s966_s22, 1 }
   0xe   : > { %315 = sbr.rel (%p978_p4) target bundleno = 21 (0x15), region = 44  ;;  %v316_v0 = vld [vmem:[%s1343_s0] sm:$0xf] (!%p978_p4) }
   0xf   : > { %s1224_s24 = sshll.u32 %s288_s23, 3  ;;  %s1050_s25 = sshll.u32 %s288_s23, 9  ;;  %317 = vst [vmem:[#allocation2] sm:$0xf] (!%p978_p4), %v316_v0 }
  0x10   : > { %s290_s28 = scalar_lea.vmem %s1344_s1, %s1224_s24  ;;  %s294_s7 = scalar_lea.vmem %s1345_s2, %s1224_s24 }
  0x11   : > { %s1237_s10 = scalar_lea.vmem %s1346_s3, %s1050_s25  ;;  %s975_s11 = sshll.u32 %s288_s23, 2 }
  0x12   : > { %s1242_s14 = scalar_lea.vmem %s1347_s4, %s975_s11  ;;  %s307_s17 = scalar_lea.vmem %s1348_s5, %s1224_s24 }
  0x13   : > { %s311_s20 = scalar_lea.vmem %s1349_s6, %s1224_s24 }
  0x15 PF: > { %v1059_v1 = vld [vmem:[%s1237_s10 + $0x4] ss:$16 sps:$4 sm:$0xff]   ;;  %v1061_v2 = vld [vmem:[%s1237_s10] ss:$16 sps:$4 sm:$0xff]   ;;  %v1070_v6 = vld [vmem:[%s1237_s10 + $0xc] ss:$16 sps:$4 sm:$0xff]  }
  0x16   : > { %735 = vmatprep.subr.bf16.mxu0 %v1059_v1  ;;  %v1062_v3 = vld [vmem:[%s1237_s10 + $0x24] ss:$16 sps:$4 sm:$0xff]   ;;  %v1064_v4 = vld [vmem:[%s1237_s10 + $0x20] ss:$16 sps:$4 sm:$0xff]   ;;  %v1073_v7 = vld [vmem:[%s1237_s10 + $0x8] ss:$16 sps:$4 sm:$0xff]   ;;  %776 = vmatprep.subr.bf16.mxu1 %v1070_v6  ;;  %v388_v6 = vlaneseq }
  0x17   : > { %736 = vmatpush1.bf16.msra.mxu0 %v1061_v2  ;;  %v1065_v5 = vld [vmem:[%s1237_s10 + $0x44] ss:$16 sps:$4 sm:$0xff]   ;;  %v1067_v8 = vld [vmem:[%s1237_s10 + $0x40] ss:$16 sps:$4 sm:$0xff]   ;;  %777 = vmatpush1.bf16.msra.mxu1 %v1073_v7  ;;  %v1076_v10 = vld [vmem:[%s1237_s10 + $0x2c] ss:$16 sps:$4 sm:$0xff]  }
  0x18   : > { %737 = vmatprep.subr.bf16.mxu0 %v1062_v3  ;;  %v1068_v9 = vld [vmem:[%s1237_s10 + $0x64] ss:$16 sps:$4 sm:$0xff]   ;;  %v1079_v11 = vld [vmem:[%s1237_s10 + $0x28] ss:$16 sps:$4 sm:$0xff]   ;;  %778 = vmatprep.subr.bf16.mxu1 %v1076_v10  ;;  %v1072_v12 = vld [vmem:[%s1237_s10 + $0x60] ss:$16 sps:$4 sm:$0xff]  }
  0x19   : > { %v1074_v13 = vld [vmem:[%s1237_s10 + $0x84] ss:$16 sps:$4 sm:$0xff]   ;;  %v1082_v14 = vld [vmem:[%s1237_s10 + $0x4c] ss:$16 sps:$4 sm:$0xff]   ;;  %v1085_v15 = vld [vmem:[%s1237_s10 + $0x48] ss:$16 sps:$4 sm:$0xff]  }
  0x1a   : > { %v1088_v16 = vld [vmem:[%s1237_s10 + $0x6c] ss:$16 sps:$4 sm:$0xff]   ;;  %v1078_v17 = vld [vmem:[%s1237_s10 + $0x80] ss:$16 sps:$4 sm:$0xff]   ;;  %v1080_v18 = vld [vmem:[%s1237_s10 + $0xa4] ss:$16 sps:$4 sm:$0xff]  }
  0x1b   : > { %738 = vmatpush1.bf16.msra.mxu0 %v1064_v4  ;;  %779 = vmatpush1.bf16.msra.mxu1 %v1079_v11  ;;  %v1091_v19 = vld [vmem:[%s1237_s10 + $0x68] ss:$16 sps:$4 sm:$0xff]   ;;  %v1094_v20 = vld [vmem:[%s1237_s10 + $0x8c] ss:$16 sps:$4 sm:$0xff]   ;;  %v1084_v21 = vld [vmem:[%s1237_s10 + $0xa0] ss:$16 sps:$4 sm:$0xff]  }
  0x1c   : > { %739 = vmatprep.subr.bf16.mxu0 %v1065_v5  ;;  %780 = vmatprep.subr.bf16.mxu1 %v1082_v14  ;;  %v1086_v22 = vld [vmem:[%s1237_s10 + $0xc4] ss:$16 sps:$4 sm:$0xff]   ;;  %v1097_v23 = vld [vmem:[%s1237_s10 + $0x88] ss:$16 sps:$4 sm:$0xff]   ;;  %v1100_v24 = vld [vmem:[%s1237_s10 + $0xac] ss:$16 sps:$4 sm:$0xff]  }
  0x1d   : > { %v1090_v25 = vld [vmem:[%s1237_s10 + $0xc0] ss:$16 sps:$4 sm:$0xff]   ;;  %v1092_v26 = vld [vmem:[%s1237_s10 + $0xe4] ss:$16 sps:$4 sm:$0xff]   ;;  %v1103_v27 = vld [vmem:[%s1237_s10 + $0xa8] ss:$16 sps:$4 sm:$0xff]  }
  0x1e   : > { %v1106_v28 = vld [vmem:[%s1237_s10 + $0xcc] ss:$16 sps:$4 sm:$0xff]   ;;  %v1096_v29 = vld [vmem:[%s1237_s10 + $0xe0] ss:$16 sps:$4 sm:$0xff]   ;;  %v1098_v30 = vld [vmem:[%s1237_s10 + $0x104] ss:$16 sps:$4 sm:$0xff]  }
  0x1f   : > { %740 = vmatpush1.bf16.msra.mxu0 %v1067_v8  ;;  %781 = vmatpush1.bf16.msra.mxu1 %v1085_v15  ;;  %v1109_v31 = vld [vmem:[%s1237_s10 + $0xc8] ss:$16 sps:$4 sm:$0xff]   ;;  %v1112_v32 = vld [vmem:[%s1237_s10 + $0xec] ss:$16 sps:$4 sm:$0xff]   ;;  %v1102_v33 = vld [vmem:[%s1237_s10 + $0x100] ss:$16 sps:$4 sm:$0xff]  }
  0x20   : > { %741 = vmatprep.subr.bf16.mxu0 %v1068_v9  ;;  %782 = vmatprep.subr.bf16.mxu1 %v1088_v16  ;;  %v1104_v34 = vld [vmem:[%s1237_s10 + $0x124] ss:$16 sps:$4 sm:$0xff]   ;;  %v1115_v35 = vld [vmem:[%s1237_s10 + $0xe8] ss:$16 sps:$4 sm:$0xff]   ;;  %v1118_v36 = vld [vmem:[%s1237_s10 + $0x10c] ss:$16 sps:$4 sm:$0xff]  }
  0x21   : > { %v1108_v37 = vld [vmem:[%s1237_s10 + $0x120] ss:$16 sps:$4 sm:$0xff]   ;;  %v1110_v38 = vld [vmem:[%s1237_s10 + $0x144] ss:$16 sps:$4 sm:$0xff]   ;;  %v1121_v39 = vld [vmem:[%s1237_s10 + $0x108] ss:$16 sps:$4 sm:$0xff]  }
  0x22   : > { %v1124_v40 = vld [vmem:[%s1237_s10 + $0x12c] ss:$16 sps:$4 sm:$0xff]   ;;  %v1114_v41 = vld [vmem:[%s1237_s10 + $0x140] ss:$16 sps:$4 sm:$0xff]   ;;  %v1116_v43 = vld [vmem:[%s1237_s10 + $0x164] ss:$16 sps:$4 sm:$0xff]  }
  0x23   : > { %742 = vmatpush1.bf16.msra.mxu0 %v1072_v12  ;;  %783 = vmatpush1.bf16.msra.mxu1 %v1091_v19  ;;  %v318_v42 = vld [vmem:[%s290_s28] sm:$0xff]  ;;  %v1127_v45 = vld [vmem:[%s1237_s10 + $0x128] ss:$16 sps:$4 sm:$0xff]   ;;  %v1130_v46 = vld [vmem:[%s1237_s10 + $0x14c] ss:$16 sps:$4 sm:$0xff]   ;;  %v389_v7 = vshrl.u32 %v388_v6, 7 }
  0x24   : > { %743 = vmatprep.subr.bf16.mxu0 %v1074_v13  ;;  %784 = vmatprep.subr.bf16.mxu1 %v1094_v20  ;;  %v319_v44 = vpack.c.bf16 %v318_v42, %v318_v42  ;;  %v1120_v47 = vld [vmem:[%s1237_s10 + $0x160] ss:$16 sps:$4 sm:$0xff]   ;;  %v1122_v48 = vld [vmem:[%s1237_s10 + $0x184] ss:$16 sps:$4 sm:$0xff]   ;;  %v1133_v49 = vld [vmem:[%s1237_s10 + $0x148] ss:$16 sps:$4 sm:$0xff]  }
  0x25   : > { %v1136_v50 = vld [vmem:[%s1237_s10 + $0x16c] ss:$16 sps:$4 sm:$0xff]   ;;  %v1126_v51 = vld [vmem:[%s1237_s10 + $0x180] ss:$16 sps:$4 sm:$0xff]   ;;  %v1128_v52 = vld [vmem:[%s1237_s10 + $0x1a4] ss:$16 sps:$4 sm:$0xff]  }
  0x26   : > { %320 = vst [vmem:[#allocation2 + $0x4] sm:$0xf] %v319_v44  ;;  %v1139_v53 = vld [vmem:[%s1237_s10 + $0x168] ss:$16 sps:$4 sm:$0xff]   ;;  %v1142_v55 = vld [vmem:[%s1237_s10 + $0x18c] ss:$16 sps:$4 sm:$0xff]  }
  0x27   : > { %744 = vmatpush1.bf16.msra.mxu0 %v1078_v17  ;;  %785 = vmatpush1.bf16.msra.mxu1 %v1097_v23  ;;  %v1132_v57 = vld [vmem:[%s1237_s10 + $0x1a0] ss:$16 sps:$4 sm:$0xff]   ;;  %v1134_v58 = vld [vmem:[%s1237_s10 + $0x1c4] ss:$16 sps:$4 sm:$0xff]   ;;  %v1145_v59 = vld [vmem:[%s1237_s10 + $0x188] ss:$16 sps:$4 sm:$0xff]  }
  0x28   : > { %745 = vmatprep.subr.bf16.mxu0 %v1080_v18  ;;  %786 = vmatprep.subr.bf16.mxu1 %v1100_v24  ;;  %v1148_v60 = vld [vmem:[%s1237_s10 + $0x1ac] ss:$16 sps:$4 sm:$0xff]   ;;  %v1138_v61 = vld [vmem:[%s1237_s10 + $0x1c0] ss:$16 sps:$4 sm:$0xff]   ;;  %v1140_v62 = vld [vmem:[%s1237_s10 + $0x1e4] ss:$16 sps:$4 sm:$0xff]  }
  0x29   : > { %v1150_v63 = vld [vmem:[%s1237_s10 + $0x1a8] ss:$16 sps:$4 sm:$0xff]   ;;  %v1151_v0 = vld [vmem:[%s1237_s10 + $0x1cc] ss:$16 sps:$4 sm:$0xff]   ;;  %v1144_v1 = vld [vmem:[%s1237_s10 + $0x1e0] ss:$16 sps:$4 sm:$0xff]  }
  0x2a   : > { %v1153_v2 = vld [vmem:[%s1237_s10 + $0x1c8] ss:$16 sps:$4 sm:$0xff]   ;;  %v1154_v3 = vld [vmem:[%s1237_s10 + $0x1ec] ss:$16 sps:$4 sm:$0xff]   ;;  %v390_v8 = vsub.s32 0, %v389_v7  ;;  %v394_v10 = vsub.s32 1, %v389_v7 }
  0x2b   : > { %746 = vmatpush1.bf16.msra.mxu0 %v1084_v21  ;;  %787 = vmatpush1.bf16.msra.mxu1 %v1103_v27  ;;  %v1156_v5 = vld [vmem:[%s1237_s10 + $0x1e8] ss:$16 sps:$4 sm:$0xff]   ;;  %v386_v9 = vld [vmem:[%s1242_s14] sm:$0xf]  ;;  %v402_v13 = vsub.s32 3, %v389_v7  ;;  %v398_v23 = vsub.s32 2, %v389_v7 }
  0x2c   : > { %747 = vmatprep.subr.bf16.mxu0 %v1086_v22  ;;  %788 = vmatprep.subr.bf16.mxu1 %v1106_v28  ;;  %v391_v11 = vrot.slane %v386_v9, %v390_v8  ;;  %v395_v12 = vrot.slane %v386_v9, %v394_v10 }
  0x2d   : > { %v321_v54 = vld [vmem:[#allocation2] sm:$0xff]  ;;  %v403_v21 = vrot.slane %v386_v9, %v402_v13  ;;  %v399_v28 = vrot.slane %v386_v9, %v398_v23 }
  0x2e   : > { %v980_v56 = vcombine.high %v321_v54, %v321_v54  ;;  %v979_v4 = vcombine.low %v321_v54, %v321_v54 }
  0x2f   : > { %748 = vmatpush1.bf16.msra.mxu0 %v1090_v25  ;;  %789 = vmatpush1.bf16.msra.mxu1 %v1109_v31 }
  0x30   : > { %749 = vmatprep.subr.bf16.mxu0 %v1092_v26  ;;  %790 = vmatprep.subr.bf16.mxu1 %v1112_v32 }
  0x31   : > { %767 = vmatprep.mubr.bf16.mxu0 %v980_v56  ;;  %808 = vmatprep.mubr.bf16.mxu1 %v980_v56 }
  0x33   : > { %750 = vmatpush1.bf16.msra.mxu0 %v1096_v29  ;;  %791 = vmatpush1.bf16.msra.mxu1 %v1115_v35 }
  0x34   : > { %751 = vmatprep.subr.bf16.mxu0 %v1098_v30  ;;  %792 = vmatprep.subr.bf16.mxu1 %v1118_v36 }
  0x37   : > { %752 = vmatpush1.bf16.msra.mxu0 %v1102_v33  ;;  %793 = vmatpush1.bf16.msra.mxu1 %v1121_v39 }
  0x38   : > { %753 = vmatprep.subr.bf16.mxu0 %v1104_v34  ;;  %794 = vmatprep.subr.bf16.mxu1 %v1124_v40 }
  0x3b   : > { %754 = vmatpush1.bf16.msra.mxu0 %v1108_v37  ;;  %795 = vmatpush1.bf16.msra.mxu1 %v1127_v45 }
  0x3c   : > { %755 = vmatprep.subr.bf16.mxu0 %v1110_v38  ;;  %796 = vmatprep.subr.bf16.mxu1 %v1130_v46  ;;  %v836_v38 = vld [vmem:[%s294_s7] sm:$0xff] }
  0x3f   : > { %756 = vmatpush1.bf16.msra.mxu0 %v1114_v41  ;;  %797 = vmatpush1.bf16.msra.mxu1 %v1133_v49 }
  0x40   : > { %757 = vmatprep.subr.bf16.mxu0 %v1116_v43  ;;  %798 = vmatprep.subr.bf16.mxu1 %v1136_v50 }
  0x43   : > { %758 = vmatpush1.bf16.msra.mxu0 %v1120_v47  ;;  %799 = vmatpush1.bf16.msra.mxu1 %v1139_v53 }
  0x44   : > { %759 = vmatprep.subr.bf16.mxu0 %v1122_v48  ;;  %800 = vmatprep.subr.bf16.mxu1 %v1142_v55 }
  0x47   : > { %760 = vmatpush1.bf16.msra.mxu0 %v1126_v51  ;;  %801 = vmatpush1.bf16.msra.mxu1 %v1145_v59 }
  0x48   : > { %761 = vmatprep.subr.bf16.mxu0 %v1128_v52  ;;  %802 = vmatprep.subr.bf16.mxu1 %v1148_v60 }
  0x4b   : > { %762 = vmatpush1.bf16.msra.mxu0 %v1132_v57  ;;  %803 = vmatpush1.bf16.msra.mxu1 %v1150_v63 }
  0x4c   : > { %763 = vmatprep.subr.bf16.mxu0 %v1134_v58  ;;  %804 = vmatprep.subr.bf16.mxu1 %v1151_v0 }
  0x4f   : > { %764 = vmatpush1.bf16.msra.mxu0 %v1138_v61  ;;  %805 = vmatpush1.bf16.msra.mxu1 %v1153_v2 }
  0x50   : > { %765 = vmatprep.subr.bf16.mxu0 %v1140_v62  ;;  %806 = vmatprep.subr.bf16.mxu1 %v1154_v3 }
  0x53   : > { %766 = vmatpush1.bf16.msra.mxu0 %v1144_v1  ;;  %807 = vmatpush1.bf16.msra.mxu1 %v1156_v5 }
  0x56   : > { %768 = vmatmul.mubr.bf16.vlgmr.msra.gmra.mrb[0].mxu0 %v979_v4  ;;  %809 = vmatmul.mubr.bf16.vlgmr.msra.gmra.mrb[0].mxu1 %v979_v4 }
 0x129   : > { %v769_v14 = vpop.f32.mrb[0].mxu0  ;;  %v810_v24 = vpop.f32.mrb[0].mxu1 }
 0x12a   : > { %v770_v15 = vadd.f32 %v769_v14, %v391_v11  ;;  %v771_v16 = vpop.f32.mrb[1].mxu0  ;;  %v812_v25 = vpop.f32.mrb[1].mxu1  ;;  %v811_v31 = vadd.f32 %v810_v24, %v399_v28 }
 0x12b   : > { %v772_v17 = vadd.f32 %v771_v16, %v395_v12  ;;  %v773_v18 = vpop.f32.mrb[2].mxu0  ;;  %v813_v26 = vadd.f32 %v812_v25, %v403_v21  ;;  %v814_v27 = vpop.f32.mrb[2].mxu1 }
 0x12c   : > { %v1045_v19 = vmul.f32 -1.442695, %v770_v15  ;;  %v774_v20 = vpop.f32.mrb[3].mxu0  ;;  %v815_v29 = vpop.f32.mrb[3].mxu1 }
 0x12d   : > { %v1046_v22 = vmul.f32 -1.442695, %v772_v17  ;;  %v1047_v30 = vmul.f32 -1.442695, %v813_v26 }
 0x12e   : > { %1157 = vpow2.f32 %v1045_v19 }
 0x12f   : > { %1159 = vpow2.f32 %v1046_v22 }
 0x130   : > { %1161 = vpow2.f32 %v1047_v30 }
 0x131   : > { %1163 = vtanh.f32 %v811_v31 }
 0x138   : > { %v1158_v32 = vpop.eup %1157 }
 0x139   : > { %v1160_v33 = vpop.eup %1159  ;;  %v820_v34 = vadd.f32 1.0, %v1158_v32 }
 0x13a   : > { %v826_v35 = vadd.f32 1.0, %v1160_v33  ;;  %v1162_v36 = vpop.eup %1161 }
 0x13b   : > { %1165 = vrcp.f32 %v820_v34  ;;  %v1164_v37 = vpop.eup %1163  ;;  %v833_v40 = vadd.f32 1.0, %v1162_v36 }
 0x13c   : > { %1167 = vrcp.f32 %v826_v35 }
 0x13d   : > { %1169 = vrcp.f32 %v833_v40 }
 0x145   : > { %v1166_v39 = vpop.eup %1165 }
 0x146   : > { %v1168_v41 = vpop.eup %1167  ;;  %v838_v42 = vmul.f32 %v1166_v39, %v1164_v37 }
 0x147   : > { %v837_v43 = vmul.f32 %v1168_v41, %v836_v38  ;;  %v1170_v45 = vpop.eup %1169 }
 0x149   : > { %v839_v44 = vadd.f32 %v838_v42, %v837_v43 }
 0x14b   : > { %1171 = vtanh.f32 %v839_v44  ;;  %843 = vst [vmem:[%s311_s20] sm:$0xff] %v839_v44 }
 0x155   : > { %v1172_v46 = vpop.eup %1171 }
 0x156   : > { %v841_v47 = vmul.f32 %v1172_v46, %v1170_v45 }
 0x158   : > { %842 = vst [vmem:[%s307_s17] sm:$0xff] %v841_v47  ;;  %v844_v48 = vpack.c.bf16 %v841_v47, %v841_v47 }
 0x15a   : > { %845 = vst [vmem:[#allocation2] sm:$0xf] %v844_v48 }
 0x15b PF: > { %s17_s21 = sadd.s32 1, %s1179_s21  }
 0x15c   : > { %p14_p5 = scmp.ge.s32.totalorder %s17_s21, 4  }
 0x15e   :  { %16 = sbr.rel (!%p14_p5) target bundleno = 1 (0x1), region = 95 }

</bundles_post_ra>
